<compile_context>
chip_gen: v5e
topology: v5e:2x2
jax: 0.10.0
libtpu: 0.0.40
codegen_flags: <defaults>
</compile_context>

<pallas_src>
import functools

import jax
import jax.numpy as jnp
from jax.experimental import pallas as pl
from jax.experimental.pallas import tpu as pltpu  # noqa: F401  (kept for TPU-specific extensions)

jax.config.update("jax_default_matmul_precision", "float32")

DROP_P = 0.1
HIDDEN = 20
SAMPLING = 16   # small for the demo (module default is 100)


# ----------------------------------------------------------------------------
# Predict-mode kernel (mc_flg = False): result = net(x); separate(result)
# ----------------------------------------------------------------------------
def _predict_kernel(xt_ref, w1_ref, b1_ref, w2_ref, b2_ref, w3_ref, b3_ref,
                    out_ref):
    x = xt_ref[...]                                              # (1, N)
    # Linear(1, H) + ReLU: W1:(H,1) broadcast-multiplied against x:(1, N).
    h1 = jnp.maximum(w1_ref[...] * x + b1_ref[...], 0.0)         # (H, N)
    # Dropout is identity in predict/eval mode.
    h2 = jax.nn.sigmoid(
        jnp.dot(w2_ref[...], h1, preferred_element_type=jnp.float32)
        + b2_ref[...])                                           # (H, N)
    out = jnp.dot(w3_ref[...], h2, preferred_element_type=jnp.float32) \
        + b3_ref[...]                                            # (2, N)
    # separate(): row 0 = mean head, row 1 = exp(log-variance head).
    out_ref[...] = jnp.concatenate([out[0:1, :], jnp.exp(out[1:2, :])], axis=0)


def hetero_predict(x, params):
    """mc_flg=False path.  Returns (mean, sigma2), each (N, 1)."""
    w1, b1, w2, b2, w3, b3 = params
    n = x.shape[0]
    xt = x.reshape(1, n)                                         # lane-dense batch
    out = pl.pallas_call(
        _predict_kernel,
        out_shape=jax.ShapeDtypeStruct((2, n), jnp.float32),
    )(xt, w1, b1, w2, b2, w3, b3)
    return out[0].reshape(n, 1), out[1].reshape(n, 1)


# ----------------------------------------------------------------------------
# MC-mode kernel (mc_flg = True): all samples folded into the matmul M dim.
# ----------------------------------------------------------------------------
def _mc_kernel(xrep_ref, m1_ref, m2_ref, red_ref,
               w1_ref, b1_ref, w2_ref, b2_ref, w3_ref, b3_ref,
               out_ref, *, inv_sampling):
    x = xrep_ref[...]                                            # (1, S*N)
    # Linear(1, H) + ReLU for ALL samples at once.
    h1 = jnp.maximum(w1_ref[...] * x + b1_ref[...], 0.0)         # (H, S*N)
    h1 = h1 * m1_ref[...]                                        # Dropout 1 (pre-scaled mask)
    # Linear(H, H) + Sigmoid, samples folded into the matmul M dimension.
    h2 = jax.nn.sigmoid(
        jnp.dot(w2_ref[...], h1, preferred_element_type=jnp.float32)
        + b2_ref[...])                                           # (H, S*N)
    h2 = h2 * m2_ref[...]                                        # Dropout 2
    # HeteroLinear(H, 2).
    out = jnp.dot(w3_ref[...], h2, preferred_element_type=jnp.float32) \
        + b3_ref[...]                                            # (2, S*N)

    mc_mean = out[0:1, :]                                        # (1, S*N)
    mc_s2 = jnp.exp(out[1:2, :])                                 # (1, S*N)

    # Reduce the per-sample statistics across samples with one MXU matmul:
    # stats:(3, S*N) @ reduce_mat:(S*N, N) -> (3, N).
    stats = jnp.concatenate([mc_mean, mc_mean * mc_mean, mc_s2], axis=0)
    red = jnp.dot(stats, red_ref[...],
                  preferred_element_type=jnp.float32) * inv_sampling
    exp_mean = red[0:1, :]
    # variance(): E[m^2] - E[m]^2 + E[sigma^2]
    var = red[1:2, :] - exp_mean * exp_mean + red[2:3, :]
    out_ref[...] = jnp.concatenate([exp_mean, var], axis=0)      # (2, N)


def _dropout_masks(key, hidden, m, keep_prob):
    """Pre-scaled keep masks, values in {0, 1/keep_prob}."""
    k1, k2 = jax.random.split(key)
    m1 = jax.random.bernoulli(k1, keep_prob, (hidden, m)).astype(jnp.float32)
    m2 = jax.random.bernoulli(k2, keep_prob, (hidden, m)).astype(jnp.float32)
    return m1 / keep_prob, m2 / keep_prob


def hetero_mc_forward(x, params, key, sampling=SAMPLING):
    """mc_flg=True path.  Returns (mean, var), each (N, 1)."""
    w1, b1, w2, b2, w3, b3 = params
    n = x.shape[0]
    h = w1.shape[0]
    m = sampling * n

    # Replicate x across samples along the lane axis (sample-major columns).
    x_rep = jnp.tile(x.reshape(1, n), (1, sampling))             # (1, S*N)
    mask1, mask2 = _dropout_masks(key, h, m, 1.0 - DROP_P)       # (H, S*N) each
    # Block-sum matrix: column j = s*n + i contributes to output column i.
    reduce_mat = jnp.tile(jnp.eye(n, dtype=jnp.float32), (sampling, 1))  # (S*N, N)

    out = pl.pallas_call(
        functools.partial(_mc_kernel, inv_sampling=1.0 / sampling),
        out_shape=jax.ShapeDtypeStruct((2, n), jnp.float32),
    )(x_rep, mask1, mask2, reduce_mat, w1, b1, w2, b2, w3, b3)
    return out[0].reshape(n, 1), out[1].reshape(n, 1)


# ----------------------------------------------------------------------------
# Deterministic parameter construction (PyTorch Linear-style uniform init),
# stored in native PyTorch layout W:(out, in), b:(out, 1).
# ----------------------------------------------------------------------------
def init_params(key, hidden=HIDDEN):
    ks = jax.random.split(key, 6)

    def lin(kw, kb, fan_in, fan_out):
        bound = 1.0 / jnp.sqrt(jnp.float32(fan_in))
        w = jax.random.uniform(kw, (fan_out, fan_in), jnp.float32, -bound, bound)
        b = jax.random.uniform(kb, (fan_out, 1), jnp.float32, -bound, bound)
        return w, b

    w1, b1 = lin(ks[0], ks[1], 1, hidden)        # Linear(1, hidden)
    w2, b2 = lin(ks[2], ks[3], hidden, hidden)   # Linear(hidden, hidden)
    w3, b3 = lin(ks[4], ks[5], hidden, 2)        # HeteroLinear(hidden, 2)
    return (w1, b1, w2, b2, w3, b3)


# ----------------------------------------------------------------------------
# Pure-JAX references (same math, same masks).
# ----------------------------------------------------------------------------
def ref_predict(x, params):
    w1, b1, w2, b2, w3, b3 = params
    n = x.shape[0]
    xt = x.reshape(1, n)
    h1 = jnp.maximum(w1 * xt + b1, 0.0)
    h2 = jax.nn.sigmoid(w2 @ h1 + b2)
    out = w3 @ h2 + b3
    return out[0].reshape(n, 1), jnp.exp(out[1]).reshape(n, 1)


def ref_mc(x, params, key, sampling):
    w1, b1, w2, b2, w3, b3 = params
    n = x.shape[0]
    h = w1.shape[0]
    m = sampling * n
    xr = jnp.tile(x.reshape(1, n), (1, sampling))
    mask1, mask2 = _dropout_masks(key, h, m, 1.0 - DROP_P)
    h1 = jnp.maximum(w1 * xr + b1, 0.0) * mask1
    h2 = jax.nn.sigmoid(w2 @ h1 + b2) * mask2
    out = w3 @ h2 + b3
    mc_mean = out[0].reshape(sampling, n)
    mc_s2 = jnp.exp(out[1]).reshape(sampling, n)
    exp_mean = mc_mean.mean(0)
    var = (mc_mean ** 2).mean(0) - exp_mean ** 2 + mc_s2.mean(0)
    return exp_mean.reshape(n, 1), var.reshape(n, 1)


if __name__ == "__main__":
    key = jax.random.PRNGKey(0)
    k_param, k_x, k_drop = jax.random.split(key, 3)

    n = 8
    x = jax.random.normal(k_x, (n, 1), jnp.float32)
    params = init_params(k_param, HIDDEN)

    # Predict path (mc_flg = False, module default).
    mean, sigma2 = jax.block_until_ready(hetero_predict(x, params))
    mean_ref, sigma2_ref = ref_predict(x, params)
    assert mean.shape == (n, 1) and sigma2.shape == (n, 1)
    assert jnp.allclose(mean, mean_ref, atol=1e-5, rtol=1e-4)
    assert jnp.allclose(sigma2, sigma2_ref, atol=1e-5, rtol=1e-4)

    # MC path (mc_flg = True): `sampling` dropout-active forward passes,
    # all folded into one kernel invocation.
    mc_mean, mc_var = jax.block_until_ready(
        hetero_mc_forward(x, params, k_drop, sampling=SAMPLING))
    ref_mean, ref_var = ref_mc(x, params, k_drop, sampling=SAMPLING)
    assert mc_mean.shape == (n, 1) and mc_var.shape == (n, 1)
    assert jnp.allclose(mc_mean, ref_mean, atol=1e-4, rtol=1e-3)
    assert jnp.allclose(mc_var, ref_var, atol=1e-4, rtol=1e-3)
    assert bool(jnp.all(mc_var > 0.0))

    print("KERNEL_OK")
</pallas_src>

<mosaic_0001>
module attributes {stable_mosaic.version = 11 : i64} {
  func.func @_predict_kernel(%arg0: memref<1x8xf32, #tpu.memory_space<vmem>>, %arg1: memref<20x1xf32, #tpu.memory_space<vmem>>, %arg2: memref<20x1xf32, #tpu.memory_space<vmem>>, %arg3: memref<20x20xf32, #tpu.memory_space<vmem>>, %arg4: memref<20x1xf32, #tpu.memory_space<vmem>>, %arg5: memref<2x20xf32, #tpu.memory_space<vmem>>, %arg6: memref<2x1xf32, #tpu.memory_space<vmem>>, %arg7: memref<2x8xf32, #tpu.memory_space<vmem>>) attributes {dimension_semantics = [], scalar_prefetch = 0 : i64, scratch_operands = 0 : i64, tpu.core_type = #tpu.core_type<tc>} {
    %c0 = arith.constant 0 : index
    %c0_0 = arith.constant 0 : index
    %0 = vector.load %arg0[%c0, %c0_0] : memref<1x8xf32, #tpu.memory_space<vmem>>, vector<1x8xf32>
    %c0_1 = arith.constant 0 : index
    %c0_2 = arith.constant 0 : index
    %1 = vector.load %arg1[%c0_1, %c0_2] : memref<20x1xf32, #tpu.memory_space<vmem>>, vector<20x1xf32>
    %2 = vector.broadcast %1 : vector<20x1xf32> to vector<20x8xf32>
    %3 = vector.broadcast %0 : vector<1x8xf32> to vector<20x8xf32>
    %4 = arith.mulf %2, %3 : vector<20x8xf32>
    %c0_3 = arith.constant 0 : index
    %c0_4 = arith.constant 0 : index
    %5 = vector.load %arg2[%c0_3, %c0_4] : memref<20x1xf32, #tpu.memory_space<vmem>>, vector<20x1xf32>
    %6 = vector.broadcast %5 : vector<20x1xf32> to vector<20x8xf32>
    %7 = arith.addf %4, %6 : vector<20x8xf32>
    %cst = arith.constant 0.000000e+00 : f32
    %8 = vector.broadcast %cst : f32 to vector<20x8xf32>
    %9 = arith.maximumf %7, %8 : vector<20x8xf32>
    %c0_5 = arith.constant 0 : index
    %c0_6 = arith.constant 0 : index
    %10 = vector.load %arg3[%c0_5, %c0_6] : memref<20x20xf32, #tpu.memory_space<vmem>>, vector<20x20xf32>
    %cst_7 = arith.constant dense<0.000000e+00> : vector<20x8xf32>
    %11 = tpu.matmul %10, %9, %cst_7 {dimension_numbers = #tpu.dot_dimension_numbers<[1], [0], [0], [1], [0, 0, 1, 1], [], []>, precision = #tpu.contract_precision<fp32>} : vector<20x20xf32>, vector<20x8xf32>, vector<20x8xf32> -> vector<20x8xf32>
    %c0_8 = arith.constant 0 : index
    %c0_9 = arith.constant 0 : index
    %12 = vector.load %arg4[%c0_8, %c0_9] : memref<20x1xf32, #tpu.memory_space<vmem>>, vector<20x1xf32>
    %13 = vector.broadcast %12 : vector<20x1xf32> to vector<20x8xf32>
    %14 = arith.addf %11, %13 : vector<20x8xf32>
    %15 = arith.negf %14 : vector<20x8xf32>
    %16 = math.exp %15 : vector<20x8xf32>
    %cst_10 = arith.constant 1.000000e+00 : f32
    %17 = vector.broadcast %cst_10 : f32 to vector<20x8xf32>
    %18 = arith.addf %17, %16 : vector<20x8xf32>
    %19 = arith.divf %17, %18 : vector<20x8xf32>
    %c0_11 = arith.constant 0 : index
    %c0_12 = arith.constant 0 : index
    %20 = vector.load %arg5[%c0_11, %c0_12] : memref<2x20xf32, #tpu.memory_space<vmem>>, vector<2x20xf32>
    %cst_13 = arith.constant dense<0.000000e+00> : vector<2x8xf32>
    %21 = tpu.matmul %20, %19, %cst_13 {dimension_numbers = #tpu.dot_dimension_numbers<[1], [0], [0], [1], [0, 0, 1, 1], [], []>, precision = #tpu.contract_precision<fp32>} : vector<2x20xf32>, vector<20x8xf32>, vector<2x8xf32> -> vector<2x8xf32>
    %c0_14 = arith.constant 0 : index
    %c0_15 = arith.constant 0 : index
    %22 = vector.load %arg6[%c0_14, %c0_15] : memref<2x1xf32, #tpu.memory_space<vmem>>, vector<2x1xf32>
    %23 = vector.broadcast %22 : vector<2x1xf32> to vector<2x8xf32>
    %24 = arith.addf %21, %23 : vector<2x8xf32>
    %25 = vector.extract_strided_slice %24 {offsets = [0, 0], sizes = [1, 8], strides = [1, 1]} : vector<2x8xf32> to vector<1x8xf32>
    %26 = vector.extract_strided_slice %24 {offsets = [1, 0], sizes = [1, 8], strides = [1, 1]} : vector<2x8xf32> to vector<1x8xf32>
    %27 = math.exp %26 : vector<1x8xf32>
    %28 = tpu.concatenate %25, %27 in 0 : vector<1x8xf32>, vector<1x8xf32> -> vector<2x8xf32>
    %c0_16 = arith.constant 0 : index
    %c0_17 = arith.constant 0 : index
    %29 = vector.load %arg7[%c0_16, %c0_17] : memref<2x8xf32, #tpu.memory_space<vmem>>, vector<2x8xf32>
    tpu.vector_store %arg7[%c0_16, %c0_17], %28 {strides = array<i32>} : memref<2x8xf32, #tpu.memory_space<vmem>>, vector<2x8xf32>,
    return
  }
}

</mosaic_0001>

<bundles_post_ra>
// kernel: tpu_custom_call.1
= control target key start
LH: loop header
LB: loop body
LE: loop exit
PB: predicated region body
PF: predicated region fallthrough
CT: control target
= control target key end

     0   :  { %v658_v2 = vmov 0   ;;  %s772_s0 = inlined_call_operand.vmem [shape: f32[1,8], index: 0, kind: input, shape index: {}]   ;;  %s773_s1 = inlined_call_operand.vmem [shape: f32[20,1], index: 1, kind: input, shape index: {}]   ;;  %s774_s2 = inlined_call_operand.vmem [shape: f32[20,1], index: 2, kind: input, shape index: {}]   ;;  %s775_s3 = inlined_call_operand.vmem [shape: f32[20,20], index: 3, kind: input, shape index: {}]   ;;  %s776_s4 = inlined_call_operand.vmem [shape: f32[20,1], index: 4, kind: input, shape index: {}]   ;;  %s777_s5 = inlined_call_operand.vmem [shape: f32[2,20], index: 5, kind: input, shape index: {}]   ;;  %s778_s6 = inlined_call_operand.vmem [shape: f32[2,1], index: 6, kind: input, shape index: {}]   ;;  %s779_s7 = inlined_call_operand.hbm [shape: f32[2,8], index: 7, kind: output, shape index: {}]  }
   0x1   :  { %v30_v0 = vld [vmem:[%s773_s1 + $0x10] sm:$0xf]  ;;  %v29_v1 = vld [vmem:[%s773_s1 + $0x8] sm:$0xff]  ;;  %615 = vset.pattern.permute.xlu1 %v658_v2  ;;  %614 = vset.pattern.permute.xlu0 %v658_v2 }
   0x2   :  { %v53_v3 = vld [vmem:[%s774_s2 + $0x8] sm:$0xff]  ;;  %43 = vperm.xlu0 %614, %v30_v0   ;;  %38 = vperm.xlu1 %615, %v29_v1  }
   0x3   :  { %616 = vset.pattern.permute.xlu2 %v658_v2 }
   0x4   :  { %12 = vsyncpa [#allocation3], 0  ;;  %62 = vperm.xlu2 %616, %v53_v3   ;;  %v54_v4 = vld [vmem:[%s774_s2 + $0x10] sm:$0xf]  ;;  %v28_v5 = vld [vmem:[%s773_s1] sm:$0xff]  ;;  %vm97_vm0 = vcmask 162816  }
   0x5   :  { %v52_v6 = vld [vmem:[%s774_s2] sm:$0xff]  ;;  %v81_v7 = vld [vmem:[%s776_s4 + $0x10] sm:$0xf]  ;;  %v80_v8 = vld [vmem:[%s776_s4 + $0x8] sm:$0xff]  ;;  %vm107_vm1 = vcmask 1043456   ;;  %s600_s28 = sshll.u32 %s779_s7, 4  ;;  %s601_s28 = int_to_ptr.hbm [resolvable:$true] %s600_s28 }
   0x6   :  { %v79_v9 = vld [vmem:[%s776_s4] sm:$0xff]  ;;  %v77_v20 = vld [vmem:[%s775_s3 + $0x8] sm:$0xff]  ;;  %v78_v35 = vld [vmem:[%s775_s3 + $0x10] sm:$0xf]  ;;  %vm589_vm14 = vcmask 1040384   ;;  %vm591_vm15 = vcmask 58368  }
   0x7   :  { %v403_v10 = vld [vmem:[%s778_s6] sm:$0x3]  ;;  %v102_v23 = vsel %vm97_vm0, %v77_v20, 0  ;;  %v105_v42 = vsel %vm97_vm0, %v78_v35, 0 }
   0x8   :  { %v76_v11 = vld [vmem:[%s775_s3] sm:$0xff]  ;;  %v744_v31 = vand.u32 4294901760, %v102_v23  ;;  %v146_v49 = vand.u32 4294901760, %v105_v42 }
   0x9   :  { %v617_v12 = vld [vmem:[%s772_s0] ss:$0 sm:$0xff]  ;;  %v99_v13 = vsel %vm97_vm0, %v76_v11, 0 }
   0xa   :  { %67 = vperm.xlu0 %614, %v54_v4   ;;  %33 = vperm.xlu1 %615, %v28_v5   ;;  %v737_v18 = vand.u32 4294901760, %v99_v13  ;;  %v139_v40 = vsub.f32 %v102_v23, %v744_v31  ;;  %v147_v55 = vsub.f32 %v105_v42, %v146_v49 }
   0xc   :  { %57 = vperm.xlu2 %616, %v52_v6   ;;  %v131_v22 = vsub.f32 %v99_v13, %v737_v18  ;;  %v140_v48 = vand.u32 4294901760, %v139_v40  ;;  %v148_v60 = vand.u32 4294901760, %v147_v55 }
   0xe   :  { %v132_v30 = vand.u32 4294901760, %v131_v22  ;;  %v141_v54 = vsub.f32 %v139_v40, %v140_v48  ;;  %v149_v62 = vsub.f32 %v147_v55, %v148_v60 }
  0x10   :  { %v133_v39 = vsub.f32 %v131_v22, %v132_v30  ;;  %v142_v59 = vand.u32 4294901760, %v141_v54  ;;  %v150_v63 = vand.u32 4294901760, %v149_v62 }
  0x12   :  { %94 = vperm.xlu0 %614, %v81_v7   ;;  %89 = vperm.xlu1 %615, %v80_v8   ;;  %v134_v46 = vand.u32 4294901760, %v133_v39 }
  0x14   :  { %84 = vperm.xlu2 %616, %v79_v9  }
  0x1a   :  { %406 = vperm.xlu0 %614, %v403_v10  }
  0x5e   :  { %v63_v14 = vpop.permute.xlu2 %62 }
  0x66   :  { %v58_v32 = vpop.permute.xlu2 %57 }
  0x6e   :  { %v85_v5 = vpop.permute.xlu2 %84 }
  0x74   :  { %v44_v15 = vpop.permute.xlu0 %43  ;;  %v39_v16 = vpop.permute.xlu1 %38 }
  0x75   :  { %v50_v17 = vmul.f32 %v617_v12, %v39_v16  ;;  %v51_v24 = vmul.f32 %v617_v12, %v44_v15 }
  0x77   :  { %v71_v19 = vadd.f32 %v63_v14, %v50_v17 }
  0x79   :  { %v74_v21 = vmax.f32 %v71_v19, 0.0 }
  0x7b   :  { %v126_v25 = vand.u32 4294901760, %v74_v21 }
  0x7c   :  { %v68_v26 = vpop.permute.xlu0 %67  ;;  %v34_v27 = vpop.permute.xlu1 %33 }
  0x7d   :  { %v72_v28 = vadd.f32 %v68_v26, %v51_v24  ;;  %v49_v29 = vmul.f32 %v617_v12, %v34_v27  ;;  %v175_v36 = vsub.f32 %v74_v21, %v126_v25 }
  0x7f   :  { %v75_v33 = vmax.f32 %v72_v28, 0.0  ;;  %v70_v34 = vadd.f32 %v58_v32, %v49_v29  ;;  %v176_v45 = vand.u32 4294901760, %v175_v36 }
  0x81   :  { %v109_v37 = vsel %vm107_vm1, %v75_v33, 0  ;;  %v73_v38 = vmax.f32 %v70_v34, 0.0  ;;  %v177_v53 = vsub.f32 %v175_v36, %v176_v45 }
  0x82   :  { %v124_v41 = vand.u32 4294901760, %v109_v37 }
  0x83   :  { %v128_v43 = vand.u32 4294901760, %v73_v38  ;;  %v178_v58 = vand.u32 4294901760, %v177_v53  ;;  %v402_v53 = vld [vmem:[%s777_s5] sm:$0x3]  ;;  %s659_s5 = smov [#allocation2]  }
  0x84   :  { %125 = vmatpush.msra.mxu0 %v124_v41  ;;  %251 = vmatpush.msra.mxu3 %v124_v41  ;;  %v169_v44 = vsub.f32 %v109_v37, %v124_v41  ;;  %v90_v13 = vpop.permute.xlu1 %89  ;;  %v95_v23 = vpop.permute.xlu0 %94  ;;  %s598_s25 = sshll.u32 %s659_s5, 4  ;;  %s599_s25 = int_to_ptr.vmem [resolvable:$true] %s598_s25 }
  0x85   :  { %v181_v47 = vsub.f32 %v73_v38, %v128_v43 }
  0x86   :  { %127 = vmatpush.msra.mxu0 %v126_v25  ;;  %214 = vmatpush.msra.mxu2 %v169_v44  ;;  %v170_v50 = vand.u32 4294901760, %v169_v44 }
  0x87   :  { %253 = vmatpush.msra.mxu3 %v126_v25  ;;  %v182_v51 = vand.u32 4294901760, %v181_v47 }
  0x88   :  { %129 = vmatpush.msra.mxu0 %v128_v43  ;;  %217 = vmatpush.msra.mxu2 %v175_v36  ;;  %v171_v52 = vsub.f32 %v169_v44, %v170_v50 }
  0x89   :  { %255 = vmatpush.msra.mxu3 %v128_v43  ;;  %135 = vmatmul.f32.vlgmr.msra.gmra.mxu0 %v134_v46  ;;  %v183_v57 = vsub.f32 %v181_v47, %v182_v51 }
  0x8a   :  { %291 = vmatpush.msrb.mxu0 %v170_v50  ;;  %220 = vmatpush.msra.mxu2 %v181_v47  ;;  %v172_v56 = vand.u32 4294901760, %v171_v52 }
  0x8b   :  { %223 = vmatmul.f32.vlgmr.msra.gmra.mxu2 %v131_v22  ;;  %259 = vmatmul.f32.vlgmr.msra.gmra.mxu3 %v132_v30  ;;  %v184_v61 = vand.u32 4294901760, %v183_v57 }
  0x8c   :  { %295 = vmatpush.msrb.mxu0 %v176_v45  ;;  %173 = vmatpush.msra.mxu1 %v172_v56  ;;  %v410_v56 = vsel %vm97_vm0, %v402_v53, 0 }
  0x8e   :  { %299 = vmatpush.msrb.mxu0 %v182_v51  ;;  %179 = vmatpush.msra.mxu1 %v178_v58 }
  0x90   :  { %185 = vmatpush.msra.mxu1 %v184_v61 }
  0x91   :  { %143 = vmatmul.f32.gmra.mxu0 %v142_v59  ;;  %187 = vmatmul.f32.vlgmr.msra.gmra.mxu1 %v737_v18 }
  0x92   :  { %327 = vmatpush.msrb.mxu1 %v124_v41 }
  0x93   :  { %228 = vmatmul.f32.gmra.mxu2 %v139_v40  ;;  %265 = vmatmul.f32.gmra.mxu3 %v140_v48 }
  0x94   :  { %329 = vmatpush.msrb.mxu1 %v126_v25 }
  0x96   :  { %331 = vmatpush.msrb.mxu1 %v128_v43 }
  0x99   :  { %151 = vmatmul.f32.gmra.mxu0 %v150_v63  ;;  %191 = vmatmul.f32.gmra.mxu1 %v744_v31  ;;  %v762_v63 = vand.u32 4294901760, %v410_v56 }
  0x9b   :  { %233 = vmatmul.f32.gmra.mxu2 %v147_v55  ;;  %271 = vmatmul.f32.gmra.mxu3 %v148_v60 }
  0xa1   :  { %195 = vmatmul.f32.gmra.mxu1 %v146_v49  ;;  %301 = vmatmul.f32.vlgmr.msrb.gmra.mxu0 %v737_v18 }
  0xa9   :  { %305 = vmatmul.f32.gmra.mxu0 %v744_v31  ;;  %333 = vmatmul.f32.vlgmr.msrb.gmra.mxu1 %v737_v18 }
  0xb1   :  { %309 = vmatmul.f32.gmra.mxu0 %v146_v49  ;;  %337 = vmatmul.f32.gmra.mxu1 %v744_v31 }
  0xb9   :  { %341 = vmatmul.f32.gmra.mxu1 %v146_v49 }
 0x106   :  { %v136_v0 = vpop.f32.mrf.mxu0 }
 0x107   :  { %v137_v7 = vadd.f32 %v136_v0, %v85_v5 }
 0x10e   :  { %v144_v1 = vpop.f32.mrf.mxu0  ;;  %v188_v2 = vpop.f32.mrf.mxu1 }
 0x10f   :  { %v224_v6 = vpop.f32.mrf.mxu2  ;;  %v189_v8 = vadd.f32 %v188_v2, %v137_v7  ;;  %v260_v9 = vpop.f32.mrf.mxu3  ;;  %v145_v14 = vadd.f32 %v144_v1, %v90_v13 }
 0x111   :  { %v225_v12 = vadd.f32 %v224_v6, %v189_v8 }
 0x113   :  { %v261_v16 = vadd.f32 %v260_v9, %v225_v12  ;;  %v435_v9 = vsub.f32 %v410_v56, %v762_v63 }
 0x116   :  { %v152_v3 = vpop.f32.mrf.mxu0  ;;  %v192_v4 = vpop.f32.mrf.mxu1 }
 0x117   :  { %v229_v15 = vpop.f32.mrf.mxu2  ;;  %v193_v17 = vadd.f32 %v192_v4, %v145_v14  ;;  %v266_v19 = vpop.f32.mrf.mxu3  ;;  %v153_v25 = vadd.f32 %v152_v3, %v95_v23 }
 0x119   :  { %v230_v21 = vadd.f32 %v229_v15, %v193_v17 }
 0x11b   :  { %v267_v27 = vadd.f32 %v266_v19, %v230_v21 }
 0x11e   :  { %v196_v10 = vpop.f32.mrf.mxu1  ;;  %v302_v11 = vpop.f32.mrf.mxu0 }
 0x11f   :  { %v303_v18 = vadd.f32 %v302_v11, %v261_v16  ;;  %v197_v28 = vadd.f32 %v196_v10, %v153_v25  ;;  %v234_v29 = vpop.f32.mrf.mxu2  ;;  %v272_v34 = vpop.f32.mrf.mxu3  ;;  %v436_v16 = vand.u32 4294901760, %v435_v9 }
 0x121   :  { %v235_v32 = vadd.f32 %v234_v29, %v197_v28  ;;  %v437_v23 = vsub.f32 %v435_v9, %v436_v16 }
 0x123   :  { %v273_v39 = vadd.f32 %v272_v34, %v235_v32  ;;  %v438_v28 = vand.u32 4294901760, %v437_v23 }
 0x126   :  { %v334_v20 = vpop.f32.mrf.mxu1  ;;  %v306_v24 = vpop.f32.mrf.mxu0 }
 0x127   :  { %v335_v22 = vadd.f32 %v334_v20, %v303_v18  ;;  %v307_v30 = vadd.f32 %v306_v24, %v267_v27 }
 0x129   :  { %v609_v26 = vmul.f32 -1.442695, %v335_v22 }
 0x12b   :  { %618 = vpow2.f32 %v609_v26 }
 0x12e   :  { %v338_v31 = vpop.f32.mrf.mxu1  ;;  %v310_v38 = vpop.f32.mrf.mxu0 }
 0x12f   :  { %v339_v33 = vadd.f32 %v338_v31, %v307_v30  ;;  %v311_v40 = vadd.f32 %v310_v38, %v273_v39  ;;  %v407_v39 = vpop.permute.xlu0 %406 }
 0x131   :  { %v619_v35 = vpop.eup %618  ;;  %v610_v36 = vmul.f32 -1.442695, %v339_v33 }
 0x132   :  { %v354_v37 = vadd.f32 1.0, %v619_v35 }
 0x133   :  { %620 = vpow2.f32 %v610_v36 }
 0x134   :  { %622 = vrcp.f32 %v354_v37  ;;  %v368_v62 = vand.u32 2147483648, %v354_v37  ;;  %vm362_vm6 = vweird.f32 %v354_v37  ;;  %v366_v1 = vand.u32 2147483647, %v354_v37 }
 0x136   :  { %v342_v41 = vpop.f32.mrf.mxu1  ;;  %v369_v8 = vor.u32 1.1754944e-38, %v368_v62  ;;  %vm367_vm9 = vcmp.eq.f32.partialorder %v366_v1, 8.507059e+37 }
 0x137   :  { %v343_v42 = vadd.f32 %v342_v41, %v311_v40 }
 0x139   :  { %v621_v43 = vpop.eup %620  ;;  %v611_v44 = vmul.f32 -1.442695, %v343_v42 }
 0x13a   :  { %v623_v45 = vpop.eup %622  ;;  %v355_v46 = vadd.f32 1.0, %v621_v43 }
 0x13b   :  { %624 = vpow2.f32 %v611_v44  ;;  %v358_v47 = vmul.f32 %v623_v45, %v354_v37  ;;  %vm363_vm3 = vweird.f32 %v623_v45 }
 0x13c   :  { %626 = vrcp.f32 %v355_v46  ;;  %v383_v58 = vand.u32 2147483648, %v355_v46  ;;  %v381_v59 = vand.u32 2147483647, %v355_v46  ;;  %vm377_vm4 = vweird.f32 %v355_v46  ;;  %vm364_vm7 = vmor %vm362_vm6, %vm363_vm3 }
 0x13d   :  { %v359_v48 = vsub.f32 1.0, %v358_v47 }
 0x13e   :  { %v384_v4 = vor.u32 1.1754944e-38, %v383_v58  ;;  %vm382_vm8 = vcmp.eq.f32.partialorder %v381_v59, 8.507059e+37 }
 0x13f   :  { %v360_v54 = vmul.f32 %v623_v45, %v359_v48 }
 0x141   :  { %v625_v49 = vpop.eup %624  ;;  %v361_v60 = vadd.f32 %v623_v45, %v360_v54 }
 0x142   :  { %v627_v50 = vpop.eup %626  ;;  %v356_v51 = vadd.f32 1.0, %v625_v49 }
 0x143   :  { %v373_v52 = vmul.f32 %v627_v50, %v355_v46  ;;  %vm378_vm2 = vweird.f32 %v627_v50  ;;  %v365_v5 = vsel %vm364_vm7, %v623_v45, %v361_v60 }
 0x144   :  { %628 = vrcp.f32 %v356_v51  ;;  %vm379_vm5 = vmor %vm377_vm4, %vm378_vm2  ;;  %v398_v10 = vand.u32 2147483648, %v356_v51  ;;  %v396_v12 = vand.u32 2147483647, %v356_v51  ;;  %v370_v13 = vsel %vm367_vm9, %v369_v8, %v365_v5 }
 0x145   :  { %v374_v55 = vsub.f32 1.0, %v373_v52  ;;  %vm392_vm11 = vweird.f32 %v356_v51  ;;  %v432_v18 = vand.u32 4294901760, %v370_v13 }
 0x146   :  { %v399_v17 = vor.u32 1.1754944e-38, %v398_v10  ;;  %vm397_vm13 = vcmp.eq.f32.partialorder %v396_v12, 8.507059e+37 }
 0x147   :  { %v375_v57 = vmul.f32 %v627_v50, %v374_v55  ;;  %v469_v25 = vsub.f32 %v370_v13, %v432_v18 }
 0x149   :  { %v376_v61 = vadd.f32 %v627_v50, %v375_v57  ;;  %v470_v30 = vand.u32 4294901760, %v469_v25 }
 0x14a   :  { %v629_v0 = vpop.eup %628 }
 0x14b   :  { %v388_v2 = vmul.f32 %v629_v0, %v356_v51  ;;  %v380_v3 = vsel %vm379_vm5, %v627_v50, %v376_v61  ;;  %vm393_vm10 = vweird.f32 %v629_v0  ;;  %v471_v34 = vsub.f32 %v469_v25, %v470_v30 }
 0x14c   :  { %v385_v7 = vsel %vm382_vm8, %v384_v4, %v380_v3  ;;  %vm394_vm12 = vmor %vm392_vm11, %vm393_vm10 }
 0x14d   :  { %v389_v6 = vsub.f32 1.0, %v388_v2  ;;  %v430_v14 = vand.u32 4294901760, %v385_v7  ;;  %v472_v36 = vand.u32 4294901760, %v471_v34 }
 0x14f   :  { %v390_v11 = vmul.f32 %v629_v0, %v389_v6  ;;  %v463_v21 = vsub.f32 %v385_v7, %v430_v14 }
 0x151   :  { %v391_v15 = vadd.f32 %v629_v0, %v390_v11  ;;  %v464_v27 = vand.u32 4294901760, %v463_v21 }
 0x153   :  { %v395_v19 = vsel %vm394_vm12, %v629_v0, %v391_v15  ;;  %v465_v32 = vsub.f32 %v463_v21, %v464_v27 }
 0x154   :  { %v400_v20 = vsel %vm397_vm13, %v399_v17, %v395_v19 }
 0x155   :  { %v413_v22 = vsel %vm107_vm1, %v400_v20, 0  ;;  %v466_v35 = vand.u32 4294901760, %v465_v32 }
 0x156   :  { %v428_v24 = vand.u32 4294901760, %v413_v22 }
 0x158   :  { %429 = vmatpush.msrb.mxu2 %v428_v24  ;;  %v457_v26 = vsub.f32 %v413_v22, %v428_v24 }
 0x15a   :  { %431 = vmatpush.msrb.mxu2 %v430_v14  ;;  %v458_v29 = vand.u32 4294901760, %v457_v26 }
 0x15c   :  { %433 = vmatpush.msrb.mxu2 %v432_v18  ;;  %v459_v31 = vsub.f32 %v457_v26, %v458_v29 }
 0x15d   :  { %439 = vmatmul.f32.vlgmr.msrb.gmra.mxu2 %v438_v28 }
 0x15e   :  { %494 = vmatpush.msra.mxu2 %v457_v26  ;;  %v460_v33 = vand.u32 4294901760, %v459_v31 }
 0x160   :  { %497 = vmatpush.msra.mxu2 %v463_v21  ;;  %461 = vmatpush.msrb.mxu3 %v460_v33 }
 0x162   :  { %500 = vmatpush.msra.mxu2 %v469_v25  ;;  %467 = vmatpush.msrb.mxu3 %v466_v35 }
 0x164   :  { %549 = vmatpush.msrb.mxu2 %v458_v29  ;;  %473 = vmatpush.msrb.mxu3 %v472_v36 }
 0x165   :  { %475 = vmatmul.f32.vlgmr.msrb.gmra.mxu3 %v762_v63  ;;  %503 = vmatmul.f32.vlgmr.msra.gmra.mxu2 %v435_v9 }
 0x166   :  { %553 = vmatpush.msrb.mxu2 %v464_v27  ;;  %521 = vmatpush.msra.mxu3 %v428_v24 }
 0x168   :  { %557 = vmatpush.msrb.mxu2 %v470_v30  ;;  %523 = vmatpush.msra.mxu3 %v430_v14 }
 0x16a   :  { %525 = vmatpush.msra.mxu3 %v432_v18 }
 0x16c   :  { %577 = vmatpush.msrb.mxu3 %v428_v24 }
 0x16d   :  { %529 = vmatmul.f32.vlgmr.msra.gmra.mxu3 %v436_v16  ;;  %559 = vmatmul.f32.vlgmr.msrb.gmra.mxu2 %v762_v63 }
 0x16e   :  { %579 = vmatpush.msrb.mxu3 %v430_v14 }
 0x170   :  { %581 = vmatpush.msrb.mxu3 %v432_v18 }
 0x175   :  { %583 = vmatmul.f32.vlgmr.msrb.gmra.mxu3 %v762_v63 }
 0x1e0   :  { %v440_v37 = vpop.f32.mrf.mxu2 }
 0x1e1   :  { %v441_v41 = vadd.f32 %v440_v37, %v407_v39 }
 0x1e8   :  { %v476_v38 = vpop.f32.mrf.mxu3  ;;  %v504_v40 = vpop.f32.mrf.mxu2 }
 0x1e9   :  { %v477_v42 = vadd.f32 %v476_v38, %v441_v41 }
 0x1eb   :  { %v505_v44 = vadd.f32 %v504_v40, %v477_v42 }
 0x1f0   :  { %v530_v43 = vpop.f32.mrf.mxu3  ;;  %v560_v46 = vpop.f32.mrf.mxu2 }
 0x1f1   :  { %v531_v45 = vadd.f32 %v530_v43, %v505_v44 }
 0x1f3   :  { %v561_v47 = vadd.f32 %v560_v46, %v531_v45 }
 0x1f8   :  { %v584_v48 = vpop.f32.mrf.mxu3 }
 0x1f9   :  { %v585_v49 = vadd.f32 %v584_v48, %v561_v47 }
 0x1fb   :  { %v587_v50 = vmul.f32 1.442695, %v585_v49 }
 0x1fd   :  { %630 = vpow2.f32 %v587_v50 }
 0x203   :  { %v631_v51 = vpop.eup %630 }
 0x204   :  { %v590_v52 = vsel %vm589_vm14, %v585_v49, %v631_v51 }
 0x205   :  { %592 = vst.msk [vmem:[#allocation2] sm:$0x3] %vm591_vm15, %v590_v52 }
 0x206   :  { %603 = dma.vmem_to_hbm [thread:$0]  %s599_s25, 32, %s601_s28, [#allocation3]  }
 0x207   :  { %656 = dma.done.wait [#allocation3], 32  }
 0x208   :  { %657 = vsyncadd [#allocation3], 4294967264 }
 0x209   :  { %608 = vsyncpa [#allocation3], 1 }

</bundles_post_ra>
